<compile_context>
chip_gen: v7x
topology: tpu7x:2x2x1
jax: 0.10.0
libtpu: 0.0.40
codegen_flags: <defaults>
</compile_context>

<pallas_src>
import jax
import jax.numpy as jnp
from jax import lax
from jax.experimental import pallas as pl
from jax.experimental.pallas import tpu as pltpu


def _project_kernel(embed_ref, w_ref, gb_ref, yT_ref):
    """Linear (bias elided) + BatchNorm1d (batch stats) + LeakyReLU(0.2).

    embed_ref: (B, E) f32 VMEM
    w_ref:     (P, E) f32 VMEM   (PyTorch Linear weight layout)
    gb_ref:    (P, 2) f32 VMEM   ([:,0]=gamma, [:,1]=beta)
    yT_ref:    (P, B) f32 VMEM   output, transposed so P sits on sublanes
    """
    yT = lax.dot_general(
        w_ref[...], embed_ref[...],
        dimension_numbers=(((1,), (1,)), ((), ())),      # contract over E
        preferred_element_type=jnp.float32)              # (P, B)

    # BatchNorm1d, training mode: batch mean / biased variance, eps=1e-5.
    mean = jnp.mean(yT, axis=1, keepdims=True)           # (P, 1)
    diff = yT - mean
    var = jnp.mean(diff * diff, axis=1, keepdims=True)
    scale = gb_ref[:, 0:1] * lax.rsqrt(var + 1e-5)       # gamma folded into scale
    yT = diff * scale + gb_ref[:, 1:2]

    # LeakyReLU(0.2) without a compare+select pair.
    yT_ref[...] = jnp.maximum(yT, 0.2 * yT).astype(yT_ref.dtype)


def _bcast_concat_kernel(yT_ref, inp_ref, out_ref):
    """One lane-dense tile of the broadcast + channel concat.

    yT_ref:  (P, B)            projected embedding, resident across grid steps
    inp_ref: (B, C, HW_TILE)   pass-through channels for this lane tile
    out_ref: (B, C+P, HW_TILE)
    """
    B, C, _ = inp_ref.shape
    P = yT_ref.shape[0]
    hw_t = out_ref.shape[-1]

    # Pass-through channels (the bulk of the bytes; DMA-bound, VPU copy is
    # hidden under the HBM transfers the pipeline is already doing).
    out_ref[:, 0:C, :] = inp_ref[...]

    # Per-batch lane splat of the projected column into the tail channels.
    yT = yT_ref[...]
    # TODO(synk): once B grows beyond a handful, move B onto a second
    # "parallel" grid axis instead of this static unroll.
    for b in range(B):
        out_ref[b, C:C + P, :] = jnp.broadcast_to(yT[:, b:b + 1], (P, hw_t))


def _pick_hw_tile(hw, bytes_per_lane):
    """Largest lane-dense tile dividing hw that fits a conservative VMEM budget."""
    if hw % 128 != 0:
        # TODO(synk): pad H*W to a multiple of 128; this fallback path uses
        # masked, lane-sparse stores and loses most of the layout benefit.
        return hw
    budget = 8 * 1024 * 1024      # per-step working set incl. double buffering
    best = 128
    t = 128
    while t <= min(hw, 2048):
        if hw % t == 0 and t * bytes_per_lane <= budget:
            best = t
        t += 128
    # Prefer >= 2 grid steps so pipelining / megacore sharding have work.
    if best == hw and hw > 128 and (hw // 2) % 128 == 0:
        best = hw // 2
    return best


def concat_embed(inp, embed, w, b, gamma, beta):
    """inp: (B, C, H, W); embed: (B, E); w: (E, P); b/gamma/beta: (P,).

    BatchNorm1d is evaluated in PyTorch-default training mode (batch
    statistics, biased variance, eps=1e-5); requires B > 1.  The Linear bias
    is elided because BN's batch-mean subtraction cancels it exactly in this
    mode (it would NOT cancel under eval-mode running statistics).
    """
    B, C, H, W = inp.shape
    E, P = w.shape
    HW = H * W
    del b  # exact no-op under training-mode BatchNorm (see docstring)

    w_pe = jnp.transpose(w)                   # (P, E): PyTorch Linear layout
    gb = jnp.stack([gamma, beta], axis=1)     # (P, 2): one small operand

    # --- 1) tiny projection micro-kernel (grid-less; needs cross-batch stats) ---
    yT = pl.pallas_call(
        _project_kernel,
        out_shape=jax.ShapeDtypeStruct((P, B), jnp.float32),
        in_specs=[
            pl.BlockSpec(memory_space=pltpu.MemorySpace.VMEM),   # embed
            pl.BlockSpec(memory_space=pltpu.MemorySpace.VMEM),   # w (P, E)
            pl.BlockSpec(memory_space=pltpu.MemorySpace.VMEM),   # gamma/beta
        ],
        out_specs=pl.BlockSpec(memory_space=pltpu.MemorySpace.VMEM),
    )(embed, w_pe, gb)
    yT = yT.astype(inp.dtype)

    # --- 2) bulk broadcast + concat, pipelined over lane-dense HW tiles ---
    inp_flat = inp.reshape(B, C, HW)
    bytes_per_lane = (B * C + B * (C + P)) * inp.dtype.itemsize * 2  # dbl-buffered
    hw_tile = _pick_hw_tile(HW, bytes_per_lane)
    grid = (HW // hw_tile,)

    out_flat = pl.pallas_call(
        _bcast_concat_kernel,
        out_shape=jax.ShapeDtypeStruct((B, C + P, HW), inp.dtype),
        grid=grid,
        in_specs=[
            pl.BlockSpec((P, B), lambda t: (0, 0)),              # resident
            pl.BlockSpec((B, C, hw_tile), lambda t: (0, 0, t)),  # pass-through tile
        ],
        out_specs=pl.BlockSpec((B, C + P, hw_tile), lambda t: (0, 0, t)),
        compiler_params=pltpu.CompilerParams(
            dimension_semantics=("parallel",),
            vmem_limit_bytes=32 * 1024 * 1024),
    )(yT, inp_flat)

    return out_flat.reshape(B, C + P, H, W)


def concat_embed_ref(inp, embed, w, b, gamma, beta):
    """Pure-JAX reference (faithful to the PyTorch module, bias included)."""
    y = embed @ w + b
    mean = jnp.mean(y, axis=0, keepdims=True)
    var = jnp.mean((y - mean) ** 2, axis=0, keepdims=True)
    y = (y - mean) / jnp.sqrt(var + 1e-5) * gamma + beta
    y = jnp.where(y > 0, y, 0.2 * y)
    B, C, H, W = inp.shape
    rep = jnp.broadcast_to(y[:, :, None, None], (B, y.shape[1], H, W))
    return jnp.concatenate([inp, rep], axis=1)


if __name__ == "__main__":
    # Shapes consistent with the module:
    #   embed_dim=32, projected_embed_dim=16, activation_dim=16
    B, C, H, W = 2, 4, 16, 16
    E, P = 32, 16

    key = jax.random.PRNGKey(0)
    k_inp, k_emb, k_w, k_b = jax.random.split(key, 4)

    inp = jax.random.normal(k_inp, (B, C, H, W), dtype=jnp.float32)
    embed = jax.random.normal(k_emb, (B, E), dtype=jnp.float32)

    # Deterministic synthetic parameters (Linear weight stored as (E, P)).
    w = jax.random.normal(k_w, (E, P), dtype=jnp.float32) * (1.0 / jnp.sqrt(E))
    b = jax.random.normal(k_b, (P,), dtype=jnp.float32) * 0.01
    gamma = jnp.ones((P,), dtype=jnp.float32)   # BatchNorm1d default init
    beta = jnp.zeros((P,), dtype=jnp.float32)

    out = concat_embed(inp, embed, w, b, gamma, beta)
    out = jax.block_until_ready(out)

    ref = concat_embed_ref(inp, embed, w, b, gamma, beta)
    assert out.shape == (B, C + P, H, W), out.shape
    assert jnp.allclose(out, ref, atol=1e-4, rtol=1e-4), "mismatch vs reference"

    print("KERNEL_OK")
</pallas_src>

<mosaic_0001>
module attributes {stable_mosaic.version = 11 : i64} {
  func.func @_project_kernel(%arg0: memref<2x32xf32, #tpu.memory_space<vmem>>, %arg1: memref<16x32xf32, #tpu.memory_space<vmem>>, %arg2: memref<16x2xf32, #tpu.memory_space<vmem>>, %arg3: memref<16x2xf32, #tpu.memory_space<vmem>>) attributes {dimension_semantics = [], scalar_prefetch = 0 : i64, scratch_operands = 0 : i64, tpu.core_type = #tpu.core_type<tc>} {
    %c0 = arith.constant 0 : index
    %c0_0 = arith.constant 0 : index
    %0 = vector.load %arg1[%c0, %c0_0] : memref<16x32xf32, #tpu.memory_space<vmem>>, vector<16x32xf32>
    %c0_1 = arith.constant 0 : index
    %c0_2 = arith.constant 0 : index
    %1 = vector.load %arg0[%c0_1, %c0_2] : memref<2x32xf32, #tpu.memory_space<vmem>>, vector<2x32xf32>
    %cst = arith.constant dense<0.000000e+00> : vector<16x2xf32>
    %2 = tpu.matmul %0, %1, %cst {dimension_numbers = #tpu.dot_dimension_numbers<[1], [1], [0], [0], [0, 0, 1, 0], [], []>} : vector<16x32xf32>, vector<2x32xf32>, vector<16x2xf32> -> vector<16x2xf32>
    %cst_3 = arith.constant dense<0.000000e+00> : vector<16xf32>
    %3 = vector.multi_reduction <add>, %2, %cst_3 [1] : vector<16x2xf32> to vector<16xf32>
    %4 = vector.shape_cast %3 : vector<16xf32> to vector<16x1xf32>
    %cst_4 = arith.constant 2.000000e+00 : f32
    %5 = vector.broadcast %cst_4 : f32 to vector<16x1xf32>
    %6 = arith.divf %4, %5 : vector<16x1xf32>
    %7 = vector.broadcast %6 : vector<16x1xf32> to vector<16x2xf32>
    %8 = arith.subf %2, %7 : vector<16x2xf32>
    %9 = arith.mulf %8, %8 : vector<16x2xf32>
    %cst_5 = arith.constant dense<0.000000e+00> : vector<16xf32>
    %10 = vector.multi_reduction <add>, %9, %cst_5 [1] : vector<16x2xf32> to vector<16xf32>
    %11 = vector.shape_cast %10 : vector<16xf32> to vector<16x1xf32>
    %cst_6 = arith.constant 2.000000e+00 : f32
    %12 = vector.broadcast %cst_6 : f32 to vector<16x1xf32>
    %13 = arith.divf %11, %12 : vector<16x1xf32>
    %c0_7 = arith.constant 0 : index
    %c0_8 = arith.constant 0 : index
    %14 = vector.load %arg2[%c0_7, %c0_8] : memref<16x2xf32, #tpu.memory_space<vmem>>, vector<16x1xf32>
    %cst_9 = arith.constant 9.99999974E-6 : f32
    %15 = vector.broadcast %cst_9 : f32 to vector<16x1xf32>
    %16 = arith.addf %13, %15 : vector<16x1xf32>
    %17 = math.rsqrt %16 : vector<16x1xf32>
    %18 = arith.mulf %14, %17 : vector<16x1xf32>
    %19 = vector.broadcast %18 : vector<16x1xf32> to vector<16x2xf32>
    %20 = arith.mulf %8, %19 : vector<16x2xf32>
    %c0_10 = arith.constant 0 : index
    %c1 = arith.constant 1 : index
    %21 = vector.load %arg2[%c0_10, %c1] : memref<16x2xf32, #tpu.memory_space<vmem>>, vector<16x1xf32>
    %22 = vector.broadcast %21 : vector<16x1xf32> to vector<16x2xf32>
    %23 = arith.addf %20, %22 : vector<16x2xf32>
    %cst_11 = arith.constant 2.000000e-01 : f32
    %24 = vector.broadcast %cst_11 : f32 to vector<16x2xf32>
    %25 = arith.mulf %24, %23 : vector<16x2xf32>
    %26 = arith.maximumf %23, %25 : vector<16x2xf32>
    %c0_12 = arith.constant 0 : index
    %c0_13 = arith.constant 0 : index
    %27 = vector.load %arg3[%c0_12, %c0_13] : memref<16x2xf32, #tpu.memory_space<vmem>>, vector<16x2xf32>
    tpu.vector_store %arg3[%c0_12, %c0_13], %26 {strides = array<i32>} : memref<16x2xf32, #tpu.memory_space<vmem>>, vector<16x2xf32>,
    return
  }
}

</mosaic_0001>

<bundles_post_ra>
// kernel: tpu_custom_call.1
= control target key start
LH: loop header
LB: loop body
LE: loop exit
PB: predicated region body
PF: predicated region fallthrough
CT: control target
= control target key end

     0   :  { %vm17_vm0 = vcmask 261120   ;;  %vm102_vm1 = vcmask 15360   ;;  %v187_v17 = vmov 0   ;;  %v188_v30 = vmov 1   ;;  %s236_s0 = inlined_call_operand.vmem [shape: f32[2,32], index: 0, kind: input, shape index: {}]   ;;  %s237_s1 = inlined_call_operand.vmem [shape: f32[16,32], index: 1, kind: input, shape index: {}]   ;;  %s238_s2 = inlined_call_operand.vmem [shape: f32[16,2], index: 2, kind: input, shape index: {}]   ;;  %s239_s3 = inlined_call_operand.vmem [shape: f32[16,2], index: 3, kind: output, shape index: {}]  }
   0x1   :  { %v16_v0 = vld [vmem:[%s236_s0] sm:$0x3]  ;;  %v15_v2 = vld [vmem:[%s237_s1 + $0x8] sm:$0xff]  ;;  %179 = vset.pattern.permute.xlu0 %v187_v17  ;;  %180 = vset.pattern.permute.xlu1 %v187_v17 }
   0x2   :  { %v14_v1 = vld [vmem:[%s237_s1] sm:$0xff]  ;;  %172 = vmatprep.subr.msk.mxu0 %vm17_vm0, %v16_v0  ;;  %v125_v27 = vld [vmem:[%s238_s2 + $0x8] sm:$0xff] }
   0x3   :  { %174 = vmatprep.mubr.msk.f32.mxu0 %vm17_vm0, %v14_v1  ;;  %173 = vmatpush3.xpose.msk.msra.mxu0 %vm17_vm0, %v16_v0  ;;  %v124_v24 = vld [vmem:[%s238_s2] sm:$0xff] }
   0x6   :  { %175 = vmatmul.mubr.msk.f32.vlgmr.msra.gmra.mrb[0].mxu0 %vm17_vm0, %v15_v2 }
  0xd9   :  { %v176_v3 = vpop.f32.mrb[0].mxu0 }
  0xda   :  { %v93_v4 = vpop.f32.mrb[1].mxu0  ;;  %v106_v6 = vsel %vm102_vm1, %v176_v3, 0.0 }
  0xdb   :  { %v103_v5 = vsel %vm102_vm1, %v93_v4, 0.0 }
  0xdc   :  { %104 = vadd.xlane.f32.xlu0 %v103_v5 }
  0xe0   :  { %107 = vadd.xlane.f32.xlu0 %v106_v6 }
 0x169   :  { %v105_v7 = vpop.xlane.xlu0 %104 }
 0x16a   :  { %v110_v8 = vmul.f32 0.5, %v105_v7 }
 0x16c   :  { %v112_v9 = vsub.f32 %v93_v4, %v110_v8 }
 0x16d   :  { %v108_v10 = vpop.xlane.xlu0 %107 }
 0x16e   :  { %v111_v11 = vmul.f32 0.5, %v108_v10  ;;  %v114_v12 = vmul.f32 %v112_v9, %v112_v9 }
 0x170   :  { %v113_v13 = vsub.f32 %v176_v3, %v111_v11  ;;  %v116_v14 = vsel %vm102_vm1, %v114_v12, 0.0 }
 0x171   :  { %117 = vadd.xlane.f32.xlu1 %v116_v14 }
 0x172   :  { %v115_v15 = vmul.f32 %v113_v13, %v113_v13 }
 0x174   :  { %v119_v16 = vsel %vm102_vm1, %v115_v15, 0.0 }
 0x175   :  { %120 = vadd.xlane.f32.xlu1 %v119_v16 }
 0x1fe   :  { %v118_v18 = vpop.xlane.xlu1 %117 }
 0x1ff   :  { %v122_v19 = vmul.f32 0.5, %v118_v18 }
 0x201   :  { %v126_v20 = vadd.f32 1e-05, %v122_v19 }
 0x202   :  { %v121_v21 = vpop.xlane.xlu1 %120 }
 0x203   :  { %183 = vrsqrt.f32 %v126_v20  ;;  %v123_v22 = vmul.f32 0.5, %v121_v21 }
 0x205   :  { %v127_v23 = vadd.f32 1e-05, %v123_v22 }
 0x207   :  { %185 = vrsqrt.f32 %v127_v23 }
 0x20d   :  { %v184_v25 = vpop.eup %183 }
 0x20e   :  { %v130_v26 = vmul.f32 %v184_v25, %v124_v24 }
 0x210   :  { %134 = vperm.xlu0 %179, %v130_v26  }
 0x211   :  { %v186_v28 = vpop.eup %185 }
 0x212   :  { %v131_v29 = vmul.f32 %v186_v28, %v125_v27 }
 0x214   :  { %139 = vperm.xlu1 %180, %v131_v29   ;;  %182 = vset.pattern.permute.xlu0 %v188_v30 }
 0x218   :  { %181 = vset.pattern.permute.xlu1 %v188_v30 }
 0x219   :  { %146 = vperm.xlu1 %181, %v124_v24  }
 0x21d   :  { %151 = vperm.xlu1 %181, %v125_v27  }
 0x28f   :  { %v135_v32 = vpop.permute.xlu0 %134 }
 0x290   :  { %v142_v33 = vmul.f32 %v135_v32, %v112_v9 }
 0x293   :  { %v140_v31 = vpop.permute.xlu1 %139 }
 0x294   :  { %v143_v36 = vmul.f32 %v140_v31, %v113_v13 }
 0x298   :  { %v147_v34 = vpop.permute.xlu1 %146 }
 0x299   :  { %v154_v35 = vadd.f32 %v147_v34, %v142_v33 }
 0x29b   :  { %v156_v37 = vmul.f32 0.2, %v154_v35 }
 0x29c   :  { %v152_v38 = vpop.permute.xlu1 %151 }
 0x29d   :  { %v158_v39 = vmax.f32 %v154_v35, %v156_v37  ;;  %v155_v40 = vadd.f32 %v152_v38, %v143_v36 }
 0x29f   :  { %160 = vst.msk [vmem:[%s239_s3] sm:$0xff] %vm102_vm1, %v158_v39  ;;  %v157_v41 = vmul.f32 0.2, %v155_v40 }
 0x2a1   :  { %v159_v42 = vmax.f32 %v155_v40, %v157_v41 }
 0x2a3   :  { %161 = vst.msk [vmem:[%s239_s3 + $0x8] sm:$0xff] %vm102_vm1, %v159_v42 }

</bundles_post_ra>
